<compile_context>
chip_gen: v7x
topology: tpu7x:2x2x1
jax: 0.10.0
libtpu: 0.0.40
codegen_flags: <defaults>
</compile_context>

<pallas_src>
import math

import jax
import jax.numpy as jnp
from jax.experimental import pallas as pl
from jax.experimental.pallas import tpu as pltpu

_LOG_2PI = math.log(2.0 * math.pi)


def _round_up(x, m):
    return ((x + m - 1) // m) * m


def _dynamics_log_weight_kernel(prev_ref, curr_ref, a_ref, w_ref, const_ref, out_ref):
    # prev_ref, curr_ref : [TN, DP]    packed particle tiles (DP = pack * D lanes)
    # a_ref              : [DP, DP]    block-diagonal transition matrix (resident)
    # w_ref              : [DP, PACK]  reduction/selector matrix with -0.5*exp(-logvar) folded in
    # const_ref          : [1, 1]      SMEM scalar: -0.5*(sum(logvar) + D*log(2*pi))
    # out_ref            : [TN, PACK]  one log-weight per packed particle
    prev = prev_ref[...]
    curr = curr_ref[...]

    # Transition means for all packed particles in one MXU matmul (K = DP = 128).
    mean = jnp.dot(prev, a_ref[...], preferred_element_type=jnp.float32)      # [TN, DP]
    resid = curr.astype(jnp.float32) - mean
    quad = resid * resid                                                       # [TN, DP]

    # Fused scale + per-particle reduction on the MXU (keeps the cross-lane
    # reduce off the XLU); epilogue is a single scalar add.
    log_w = jnp.dot(quad, w_ref[...], preferred_element_type=jnp.float32)      # [TN, PACK]
    out_ref[...] = (log_w + const_ref[0, 0]).astype(out_ref.dtype)


def dynamics_log_weight(prev, curr, a, logvar, *, block_rows=8192):
    """Per-particle transition log-weights via a packed, tiled Pallas TPU kernel.

    prev, curr: [N, D] float32 particles
    a:          [D, D] float32 transition matrix (applied as prev @ a)
    logvar:     [1, D] float32 per-dimension log variance
    returns:    [N]    float32

    block_rows counts *particles* per tile.  Default 8192; sweep 8192-16384 on
    v5e/v6e, 4096-8192 on v7x (64 MiB VMEM; keep the grid >= ~8 tiles so both
    TensorCores stay busy).
    """
    n, d = prev.shape

    # Pack `pack` particles into each 128-lane row (free row-major reinterpretation
    # of the same bytes) so lanes/VMEM/DMA/MXU are fully utilized for small D.
    pack = 128 // d if (d <= 128 and 128 % d == 0) else 1
    dp = d * pack

    n_p = _round_up(n, pack)
    if n_p != n:
        # Only when N is not a multiple of the pack factor (adds <= pack-1 rows).
        pad = n_p - n
        prev = jnp.pad(prev, ((0, pad), (0, 0)))
        curr = jnp.pad(curr, ((0, pad), (0, 0)))
    n_packed = n_p // pack

    prev_p = prev.reshape(n_packed, dp)
    curr_p = curr.reshape(n_packed, dp)

    # --- tiny parameter-only precompute (hoisted out of the streaming loop) ---
    a32 = a.astype(jnp.float32)
    logvar32 = logvar.astype(jnp.float32).reshape(d)
    eye_p = jnp.eye(pack, dtype=jnp.float32)

    # Block-diagonal A: lane group g of a packed row applies the same A.
    a_blk = jnp.kron(eye_p, a32)                                               # [DP, DP]
    # W[g*d + i, g] = -0.5 * exp(-logvar[i]); zero elsewhere.
    w = jnp.kron(eye_p, (-0.5 * jnp.exp(-logvar32)).reshape(d, 1))             # [DP, PACK]
    const = (-0.5 * (jnp.sum(logvar32) + d * _LOG_2PI)).reshape(1, 1)          # [1, 1]

    # Packed-row tile size: multiple of 8 sublanes.  The ragged tail block is
    # handled by Pallas (OOB rows of the edge block are never stored), so no
    # full-array padding copy is needed.
    tn = max(pack, int(block_rows)) // pack
    tn = min(tn, _round_up(n_packed, 8))
    tn = max(8, _round_up(tn, 8))
    grid = (pl.cdiv(n_packed, tn),)

    cost = pl.CostEstimate(
        flops=2 * n_packed * dp * dp + 2 * n_packed * dp + 2 * n_packed * dp * pack,
        transcendentals=0,
        bytes_accessed=(2 * n_packed * dp + dp * dp + dp * pack + n_packed * pack + 1) * 4,
    )

    # 2 inputs x 2 pipeline buffers per tile + resident params; raise the scoped
    # VMEM limit only if a large requested tile needs it (cap for v7x's 64 MiB).
    vmem_need = 4 * tn * dp * 4 + 2 * (dp * dp + dp * pack + tn * pack) * 4
    vmem_limit = None
    if vmem_need > (24 << 20):
        vmem_limit = min(vmem_need + (8 << 20), 48 << 20)

    out = pl.pallas_call(
        _dynamics_log_weight_kernel,
        out_shape=jax.ShapeDtypeStruct((n_packed, pack), jnp.float32),
        grid_spec=pltpu.PrefetchScalarGridSpec(
            num_scalar_prefetch=0,
            grid=grid,
            in_specs=[
                pl.BlockSpec((tn, dp), lambda i: (i, 0)),        # prev (packed tile)
                pl.BlockSpec((tn, dp), lambda i: (i, 0)),        # curr (packed tile)
                pl.BlockSpec((dp, dp), lambda i: (0, 0)),        # block-diag A (resident)
                pl.BlockSpec((dp, pack), lambda i: (0, 0)),      # reduction W (resident)
                pl.BlockSpec(memory_space=pltpu.MemorySpace.SMEM),  # const scalar
            ],
            out_specs=pl.BlockSpec((tn, pack), lambda i: (i, 0)),
        ),
        compiler_params=pltpu.CompilerParams(
            dimension_semantics=("parallel",),   # shard tiles across v7x's 2 TCs
            vmem_limit_bytes=vmem_limit,
        ),
        cost_estimate=cost,
    )(prev_p, curr_p, a_blk, w, const)

    return out.reshape(-1)[:n]


def _reference_log_weight(prev, curr, a, logvar):
    mean = prev @ a
    resid = curr - mean
    inv_var = jnp.exp(-logvar)
    return -0.5 * jnp.sum(resid * resid * inv_var + logvar + _LOG_2PI, axis=-1)


if __name__ == "__main__":
    key = jax.random.PRNGKey(0)
    k_prev, k_curr, k_a = jax.random.split(key, 3)

    n_particles = 200   # -> 50 packed rows; with block_rows=64 this makes a 4-tile grid
    d_state = 32        # latent state dimension (pack factor 4)

    prev = jax.random.normal(k_prev, (n_particles, d_state), dtype=jnp.float32)
    curr = jax.random.normal(k_curr, (n_particles, d_state), dtype=jnp.float32)

    # Deterministic parameter init: near-identity transition, fixed log-variance.
    a = (jnp.eye(d_state, dtype=jnp.float32)
         + 0.01 * jax.random.normal(k_a, (d_state, d_state), dtype=jnp.float32))
    logvar = jnp.full((1, d_state), -1.0, dtype=jnp.float32)

    ref = _reference_log_weight(prev, curr, a, logvar)

    # Small tile -> multi-tile grid with a ragged last block (exercises edge path).
    log_w = dynamics_log_weight(prev, curr, a, logvar, block_rows=64)
    jax.block_until_ready(log_w)
    assert log_w.shape == (n_particles,)
    assert jnp.allclose(log_w, ref, rtol=1e-5, atol=1e-4), (log_w, ref)

    # Default (production) tile size: single ragged tile here.
    log_w2 = dynamics_log_weight(prev, curr, a, logvar)
    jax.block_until_ready(log_w2)
    assert jnp.allclose(log_w2, ref, rtol=1e-5, atol=1e-4), (log_w2, ref)

    # TODO(synk): `sample()` is abstract and stochastic-model-specific; not lowered.
    print("KERNEL_OK")
</pallas_src>

<mosaic_0001>
module attributes {stable_mosaic.version = 11 : i64} {
  func.func @_dynamics_log_weight_kernel(%arg0: i32, %arg1: memref<16x128xf32, #tpu.memory_space<vmem>>, %arg2: memref<16x128xf32, #tpu.memory_space<vmem>>, %arg3: memref<128x128xf32, #tpu.memory_space<vmem>>, %arg4: memref<128x4xf32, #tpu.memory_space<vmem>>, %arg5: memref<1x1xf32, #tpu.memory_space<smem>>, %arg6: memref<16x4xf32, #tpu.memory_space<vmem>>) attributes {dimension_semantics = [#tpu.dimension_semantics<parallel>], iteration_bounds = array<i64: 4>, scalar_prefetch = 0 : i64, scratch_operands = 0 : i64, tpu.core_type = #tpu.core_type<tc>, window_params = [{transform_indices = @transform_0, window_bounds = array<i64: 16, 128>}, {transform_indices = @transform_1, window_bounds = array<i64: 16, 128>}, {pipeline_mode = #tpu.pipeline_mode<synchronous>, transform_indices = @transform_2, window_bounds = array<i64: 128, 128>}, {pipeline_mode = #tpu.pipeline_mode<synchronous>, transform_indices = @transform_3, window_bounds = array<i64: 128, 4>}, {transform_indices = @transform_4, window_bounds = array<i64: 1, 1>}, {transform_indices = @transform_5, window_bounds = array<i64: 16, 4>}]} {
    %c0 = arith.constant 0 : index
    %c0_0 = arith.constant 0 : index
    %0 = vector.load %arg1[%c0, %c0_0] : memref<16x128xf32, #tpu.memory_space<vmem>>, vector<16x128xf32>
    %c0_1 = arith.constant 0 : index
    %c0_2 = arith.constant 0 : index
    %1 = vector.load %arg2[%c0_1, %c0_2] : memref<16x128xf32, #tpu.memory_space<vmem>>, vector<16x128xf32>
    %c0_3 = arith.constant 0 : index
    %c0_4 = arith.constant 0 : index
    %2 = vector.load %arg3[%c0_3, %c0_4] : memref<128x128xf32, #tpu.memory_space<vmem>>, vector<128x128xf32>
    %cst = arith.constant dense<0.000000e+00> : vector<16x128xf32>
    %3 = tpu.matmul %0, %2, %cst {dimension_numbers = #tpu.dot_dimension_numbers<[1], [0], [0], [1], [0, 0, 1, 1], [], []>} : vector<16x128xf32>, vector<128x128xf32>, vector<16x128xf32> -> vector<16x128xf32>
    %4 = arith.subf %1, %3 : vector<16x128xf32>
    %5 = arith.mulf %4, %4 : vector<16x128xf32>
    %c0_5 = arith.constant 0 : index
    %c0_6 = arith.constant 0 : index
    %6 = vector.load %arg4[%c0_5, %c0_6] : memref<128x4xf32, #tpu.memory_space<vmem>>, vector<128x4xf32>
    %cst_7 = arith.constant dense<0.000000e+00> : vector<16x4xf32>
    %7 = tpu.matmul %5, %6, %cst_7 {dimension_numbers = #tpu.dot_dimension_numbers<[1], [0], [0], [1], [0, 0, 1, 1], [], []>} : vector<16x128xf32>, vector<128x4xf32>, vector<16x4xf32> -> vector<16x4xf32>
    %c0_8 = arith.constant 0 : index
    %c0_9 = arith.constant 0 : index
    %8 = memref.load %arg5[%c0_8, %c0_9] : memref<1x1xf32, #tpu.memory_space<smem>>
    %9 = vector.broadcast %8 : f32 to vector<16x4xf32>
    %10 = arith.addf %7, %9 : vector<16x4xf32>
    %c0_10 = arith.constant 0 : index
    %c0_11 = arith.constant 0 : index
    %11 = vector.load %arg6[%c0_10, %c0_11] : memref<16x4xf32, #tpu.memory_space<vmem>>, vector<16x4xf32>
    tpu.vector_store %arg6[%c0_10, %c0_11], %10 {strides = array<i32>} : memref<16x4xf32, #tpu.memory_space<vmem>>, vector<16x4xf32>,
    return
  }
  func.func @transform_0(%arg0: i32) -> (i32, i32) {
    %c0_i32 = arith.constant 0 : i32
    %c0_i32_0 = arith.constant 0 : i32
    return %arg0, %c0_i32 : i32, i32
  }
  func.func @transform_1(%arg0: i32) -> (i32, i32) {
    %c0_i32 = arith.constant 0 : i32
    %c0_i32_0 = arith.constant 0 : i32
    return %arg0, %c0_i32 : i32, i32
  }
  func.func @transform_2(%arg0: i32) -> (i32, i32) {
    %c0_i32 = arith.constant 0 : i32
    %c0_i32_0 = arith.constant 0 : i32
    %c0_i32_1 = arith.constant 0 : i32
    return %c0_i32, %c0_i32_0 : i32, i32
  }
  func.func @transform_3(%arg0: i32) -> (i32, i32) {
    %c0_i32 = arith.constant 0 : i32
    %c0_i32_0 = arith.constant 0 : i32
    %c0_i32_1 = arith.constant 0 : i32
    return %c0_i32, %c0_i32_0 : i32, i32
  }
  func.func @transform_4(%arg0: i32) -> (i32, i32) {
    %c0_i32 = arith.constant 0 : i32
    %c0_i32_0 = arith.constant 0 : i32
    %c0_i32_1 = arith.constant 0 : i32
    return %c0_i32, %c0_i32_0 : i32, i32
  }
  func.func @transform_5(%arg0: i32) -> (i32, i32) {
    %c0_i32 = arith.constant 0 : i32
    %c0_i32_0 = arith.constant 0 : i32
    return %arg0, %c0_i32 : i32, i32
  }
}

</mosaic_0001>

<bundles_post_ra>
// kernel: tpu_custom_call.1
= control target key start
LH: loop header
LB: loop body
LE: loop exit
PB: predicated region body
PF: predicated region fallthrough
CT: control target
= control target key end

     0   :  { %s1574_s0 = inlined_call_operand.hbm [shape: f32[50,128], index: 0, kind: input, shape index: {}]   ;;  %s1575_s1 = inlined_call_operand.hbm [shape: f32[50,128], index: 1, kind: input, shape index: {}]   ;;  %s1576_s2 = inlined_call_operand.vmem [shape: f32[128,128], index: 2, kind: input, shape index: {}]   ;;  %s1577_s3 = inlined_call_operand.vmem [shape: f32[128,4], index: 3, kind: input, shape index: {}]   ;;  %s1578_s4 = inlined_call_operand.<no memory space> [shape: f32[1,1], index: 4, kind: input, shape index: {}]   ;;  %s1579_s5 = inlined_call_operand.vmem [shape: f32[50,4], index: 5, kind: output, shape index: {}]  }
   0x1   :  { %10 = sst [smem:[#allocation2]] %s1578_s4 }
   0x2   :  { %11 = vsyncpa [#allocation4], 0 }
   0x3   :  { %13 = vsyncpa [#allocation4 + $0x1], 0 }
   0x4   :  { %14 = vsyncpa [#allocation6], 0 }
   0x5   :  { %16 = vsyncpa [#allocation6 + $0x1], 0  ;;  %s1269_s20 = smov 0   ;;  %s1271_s21 = smov 0  }
   0x6   :  { %s1273_s22 = smov 0   ;;  %s1275_s23 = smov 0  }
   0x7 LB: > { %s1288_s4 = sadd.s32 4294967295, %s1196_s23   ;;  %s1291_s24 = sadd.s32 1, %s1196_s23   ;;  %s1196_s23 = sphi %s1275_s23, %s1587_s23   ;;  %s1192_s22 = sphi %s1273_s22, %s1586_s22   ;;  %s1188_s21 = sphi %s1271_s21, %s1585_s21   ;;  %s1184_s20 = sphi %s1269_s20, %s1584_s20  }
   0x8   : > { %s26_s25 = ssub.s32 %s1196_s23, %s1291_s24  ;;  %s29_s26 = sadd.s32 1, %s1192_s22 }
   0x9   : > { %p27_p0 = scmp.eq.s32.totalorder %s26_s25, 0  ;;  %p36_p1 = scmp.ne.s32.totalorder %s1192_s22, %s1188_s21 }
   0xa   : > { %p37_p2 = scmp.eq.s32.totalorder %s1196_s23, 0  ;;  %p42_p3 = scmp.ne.s32.totalorder %s1188_s21, %s1184_s20 }
   0xb   : > { %s1301_s27 = scalar_select %p27_p0, %s1192_s22, %s29_s26  }
   0xc   : > { %p1303_p4 = por %p37_p2, %p36_p1  ;;  %p43_p5 = scmp.eq.s32.totalorder %s1288_s4, 0 }
   0xd   : > { %p155_p6 = scmp.eq.s32.totalorder %s1288_s4, 3  ;;  %p757_p9 = scmp.ge.s32.totalorder %s1196_s23, 4 }
   0xe   : > { %p1309_p7 = por %p43_p5, %p42_p3 }
   0xf   : > { %p1313_p8 = por %p155_p6, %p36_p1  ;;  %186 = sbr.rel (%p757_p9) target bundleno = 92 (0x5c), region = 28 }
  0x11   : > { %s1582_s30 = scalar_select %p1313_p8, 1, 0 }
  0x16   : > { %189 = sbr.rel (!%p1303_p4) target bundleno = 57 (0x39), region = 32  ;;  %s190_s6 = sand.u32 (%p1303_p4), 1, %s1192_s22  }
  0x17   : > { %s759_s7 = sshll.u32 (%p1303_p4), %s1196_s23, 1  ;;  %s758_s8 = sshll.u32 (%p1303_p4), %s190_s6, 4 }
  0x18   : > { %s196_s9 = ssub.s32 (%p1303_p4), 7, %s759_s7  ;;  %s1325_s12 = scalar_lea.sflag (%p1303_p4), [#allocation4], %s190_s6 }
  0x19   : > { %p197_p10 = scmp.lt.s32.totalorder (%p1303_p4), %s196_s9, 2  ;;  %s194_s13 = scalar_lea.vmem (%p1303_p4), [#allocation3], %s758_s8 }
  0x1d   : > { %s1589_s9 = smov (!%p197_p10, %s196_s9), 2 }
  0x1e   : > { %s1322_s10 = sshll.u32 %s1589_s9, 7 }
  0x1f   : > { %s201_s11 = ssub.s32 256, %s1322_s10 }
  0x20   : > { %202 = vsyncadd %s1325_s12, %s201_s11  ;;  %p761_p11 = scmp.ne.s32.totalorder %s1322_s10, 0  ;;  %s793_s14 = sshll.u32 %s1196_s23, 8 }
  0x21   : > { %s1333_s17 = scalar_lea.hbm %s1574_s0, %s793_s14  ;;  %s207_s18 = sshll.u32 %s194_s13, 4  ;;  %s1335_s18 = int_to_ptr.vmem [resolvable:$true] %s207_s18 }
  0x22   : > { %s1070_s19 = scalar_lea.hbm %s1333_s17, %s1322_s10  ;;  %s1074_s26 = scalar_lea.hbm %s1574_s0, 896 }
  0x23   : > { %p1071_p12 = scmp.ne.s32.totalorder %s1333_s17, %s1070_s19  ;;  %p1075_p1 = scmp.lt.u32.totalorder %s1333_s17, %s1574_s0 }
  0x24   : > { %p1076_p2 = scmp.lt.u32.totalorder %s1074_s26, %s1070_s19  ;;  %p1078_p5 = scmp.lt.u32.totalorder %s1070_s19, %s1333_s17 }
  0x25   : > { %p1072_p13 = pnand %p1071_p12, %p761_p11 }
  0x26   : > { %p1077_p3 = por %p1076_p2, %p1075_p1 }
  0x27   : > { %p1073_p0 = pneg %p1072_p13 }
  0x28   : > { %p1079_p6 = por %p1078_p5, %p1077_p3 }
  0x2a   : > { %p1080_p9 = pnand %p1079_p6, %p1073_p0 }
  0x2c   : > { %1083 = shalt.err (!%p1080_p9)
}
  0x2d   : > { %s1084_s8 = scalar_lea.vmem %s1335_s18, %s1322_s10  ;;  %s1230_s9 = smov [#allocation3]  }
  0x2e   : > { %p1085_p10 = scmp.ne.s32.totalorder %s1335_s18, %s1084_s8  ;;  %s1088_s11 = sshll.u32 %s1230_s9, 4  ;;  %s1089_s11 = int_to_ptr.vmem [resolvable:$false] %s1088_s11 }
  0x2f   : > { %s1090_s13 = scalar_lea.vmem %s1089_s11, 512  ;;  %p1091_p8 = scmp.lt.s32.totalorder %s1335_s18, %s1089_s11 }
  0x30   : > { %p1086_p12 = pnand %p1085_p10, %p761_p11  ;;  %p1092_p1 = scmp.lt.s32.totalorder %s1090_s13, %s1084_s8 }
  0x32   : > { %p1087_p13 = pneg %p1086_p12  ;;  %p1093_p2 = por %p1092_p1, %p1091_p8 }
  0x34   : > { %p1094_p3 = pnand %p1093_p2, %p1087_p13 }
  0x36   : > { %1097 = shalt.err (!%p1094_p3)
}
  0x37   : > { %s1231_s14 = smov 128   ;;  %s1232_s15 = smov 8  }
  0x38   : > { %213 = dma.hbm_to_vmem [thread:$0]  (%p761_p11), %s1333_s17, %s1322_s10, %s1335_s18, %s1325_s12, %s1231_s14, %s1231_s14, %s1232_s15  }
  0x39 PF: > { %216 = sbr.rel (!%p1303_p4) target bundleno = 92 (0x5c), region = 36  ;;  %s217_s16 = sand.u32 (%p1303_p4), 1, %s1192_s22  }
  0x3a   : > { %s766_s19 = sshll.u32 (%p1303_p4), %s1196_s23, 1  ;;  %s765_s20 = sshll.u32 (%p1303_p4), %s217_s16, 4 }
  0x3b   : > { %s223_s25 = ssub.s32 (%p1303_p4), 7, %s766_s19  ;;  %s1369_s7 = scalar_lea.sflag (%p1303_p4), [#allocation6], %s217_s16 }
  0x3c   : > { %p224_p8 = scmp.lt.s32.totalorder (%p1303_p4), %s223_s25, 2  ;;  %s221_s10 = scalar_lea.vmem (%p1303_p4), [#allocation5], %s765_s20 }
  0x40   : > { %s1591_s25 = smov (!%p224_p8, %s223_s25), 2 }
  0x41   : > { %s1366_s26 = sshll.u32 %s1591_s25, 7 }
  0x42   : > { %s228_s6 = ssub.s32 256, %s1366_s26 }
  0x43   : > { %229 = vsyncadd %s1369_s7, %s228_s6  ;;  %p768_p4 = scmp.ne.s32.totalorder %s1366_s26, 0  ;;  %s794_s28 = sshll.u32 %s1196_s23, 8 }
  0x44   : > { %s1377_s18 = scalar_lea.hbm %s1575_s1, %s794_s28  ;;  %s234_s8 = sshll.u32 %s221_s10, 4  ;;  %s1379_s8 = int_to_ptr.vmem [resolvable:$true] %s234_s8 }
  0x45   : > { %s1098_s9 = scalar_lea.hbm %s1377_s18, %s1366_s26  ;;  %s1102_s14 = scalar_lea.hbm %s1575_s1, 896 }
  0x46   : > { %p1099_p11 = scmp.ne.s32.totalorder %s1377_s18, %s1098_s9  ;;  %p1103_p6 = scmp.lt.u32.totalorder %s1377_s18, %s1575_s1 }
  0x47   : > { %p1104_p9 = scmp.lt.u32.totalorder %s1102_s14, %s1098_s9  ;;  %p1106_p12 = scmp.lt.u32.totalorder %s1098_s9, %s1377_s18 }
  0x48   : > { %p1100_p0 = pnand %p1099_p11, %p768_p4 }
  0x49   : > { %p1105_p10 = por %p1104_p9, %p1103_p6 }
  0x4a   : > { %p1101_p5 = pneg %p1100_p0 }
  0x4b   : > { %p1107_p13 = por %p1106_p12, %p1105_p10 }
  0x4d   : > { %p1108_p1 = pnand %p1107_p13, %p1101_p5 }
  0x4f   : > { %1111 = shalt.err (!%p1108_p1)
}
  0x50   : > { %s1112_s19 = scalar_lea.vmem %s1379_s8, %s1366_s26  ;;  %s1233_s20 = smov [#allocation5]  }
  0x51   : > { %p1113_p2 = scmp.ne.s32.totalorder %s1379_s8, %s1112_s19  ;;  %s1116_s25 = sshll.u32 %s1233_s20, 4  ;;  %s1117_s25 = int_to_ptr.vmem [resolvable:$false] %s1116_s25 }
  0x52   : > { %s1118_s6 = scalar_lea.vmem %s1117_s25, 512  ;;  %p1119_p11 = scmp.lt.s32.totalorder %s1379_s8, %s1117_s25 }
  0x53   : > { %p1114_p3 = pnand %p1113_p2, %p768_p4  ;;  %p1120_p0 = scmp.lt.s32.totalorder %s1118_s6, %s1112_s19 }
  0x55   : > { %p1115_p8 = pneg %p1114_p3  ;;  %p1121_p6 = por %p1120_p0, %p1119_p11 }
  0x57   : > { %p1122_p9 = pnand %p1121_p6, %p1115_p8 }
  0x59   : > { %1125 = shalt.err (!%p1122_p9)
}
  0x5a   : > { %s1234_s10 = smov 128   ;;  %s1235_s28 = smov 8  }
  0x5b   : > { %240 = dma.hbm_to_vmem [thread:$0]  (%p768_p4), %s1377_s18, %s1366_s26, %s1379_s8, %s1369_s7, %s1234_s10, %s1234_s10, %s1235_s28  }
  0x5c PF: > { %p772_p5 = scmp.ge.s32.totalorder %s1196_s23, 1  ;;  %p242_p10 = scmp.lt.s32.totalorder %s1196_s23, 5 }
  0x5e   : > { %p243_p12 = pnand %p772_p5, %p242_p10 }
  0x5f   : > { %s248_s12 = sand.u32 (!%p243_p12), 1, %s1188_s21  }
  0x60   : > { %246 = sbr.rel (%p243_p12) target bundleno = 624 (0x270), region = 40  ;;  %s1409_s17 = sshll.u32 (!%p243_p12), %s248_s12, 4 }
  0x61   : > { %s249_s9 = scalar_lea.sflag (!%p243_p12), [#allocation4], %s248_s12  ;;  %s252_s11 = scalar_lea.vmem (!%p243_p12), [#allocation3], %s1409_s17 }
  0x67   : > { %1175 = dma.done.wait (%p1309_p7), %s249_s9, 256  }
  0x68   : > { %1177 = vsyncadd (%p1309_p7), %s249_s9, 4294967040  ;;  %s258_s26 = scalar_lea.sflag [#allocation6], %s248_s12  ;;  %s261_s7 = scalar_lea.vmem [#allocation5], %s1409_s17 }
  0x69   : > { %1179 = dma.done.wait (%p1309_p7), %s258_s26, 256  }
  0x6a   : > { %1181 = vsyncadd (%p1309_p7), %s258_s26, 4294967040  ;;  %v311_v0 = vld [vmem:[%s1576_s2] sm:$0xff]  ;;  %v312_v1 = vld [vmem:[%s1576_s2 + $0x8] sm:$0xff]  ;;  %vm499_vm0 = vcmask 31744   ;;  %s1526_s28 = scalar_lea.vmem [#allocation7], %s1409_s17   ;;  %p1583_p7 = scmp.ne.s32.totalorder %s1582_s30, 0 }
  0x6b   : > { %v313_v2 = vld [vmem:[%s1576_s2 + $0x10] sm:$0xff]  ;;  %v904_v3 = vpack.c.bf16 %v312_v1, %v311_v0  ;;  %v314_v4 = vld [vmem:[%s1576_s2 + $0x18] sm:$0xff]  ;;  %v315_v6 = vld [vmem:[%s1576_s2 + $0x20] sm:$0xff]  ;;  %s795_s12 = sshll.u32 (%p1583_p7), %s1288_s4, 4 }
  0x6c   : > { %v908_v5 = vpack.c.bf16 %v314_v4, %v313_v2  ;;  %v316_v7 = vld [vmem:[%s1576_s2 + $0x28] sm:$0xff]  ;;  %v317_v9 = vld [vmem:[%s1576_s2 + $0x30] sm:$0xff]  ;;  %v318_v10 = vld [vmem:[%s1576_s2 + $0x38] sm:$0xff]  ;;  %s1537_s18 = scalar_lea.vmem (%p1583_p7), %s1579_s5, %s795_s12  }
  0x6d   : > { %905 = vmatprep.subr.bf16.mxu0 %v904_v3  ;;  %v912_v8 = vpack.c.bf16 %v316_v7, %v315_v6  ;;  %v307_v11 = vld [vmem:[%s252_s11] sm:$0xff]  ;;  %v407_v13 = vld [vmem:[%s1577_s3 + $0x8] sm:$0xff]  ;;  %v409_v16 = vld [vmem:[%s1577_s3 + $0x18] sm:$0xff]  ;;  %v916_v20 = vpack.c.bf16 %v318_v10, %v317_v9 }
  0x6e   : > { %907 = vmatpush3.bf16.msra.mxu0 %v904_v3  ;;  %866 = vmatprep.mubr.f32.mxu0 %v307_v11  ;;  %v406_v12 = vld [vmem:[%s1577_s3] sm:$0xff]  ;;  %v408_v14 = vld [vmem:[%s1577_s3 + $0x10] sm:$0xff]  ;;  %v411_v19 = vld [vmem:[%s1577_s3 + $0x28] sm:$0xff] }
  0x6f   : > { %909 = vmatprep.subr.bf16.mxu0 %v908_v5  ;;  %v936_v15 = vpack.c.bf16 %v407_v13, %v406_v12  ;;  %v940_v17 = vpack.c.bf16 %v409_v16, %v408_v14  ;;  %v410_v18 = vld [vmem:[%s1577_s3 + $0x20] sm:$0xff]  ;;  %v320_v22 = vld [vmem:[%s1576_s2 + $0x48] sm:$0xff]  ;;  %v412_v24 = vld [vmem:[%s1577_s3 + $0x30] sm:$0xff] }
  0x70   : > { %v319_v21 = vld [vmem:[%s1576_s2 + $0x40] sm:$0xff]  ;;  %v944_v23 = vpack.c.bf16 %v411_v19, %v410_v18  ;;  %v413_v25 = vld [vmem:[%s1577_s3 + $0x38] sm:$0xff]  ;;  %v321_v27 = vld [vmem:[%s1576_s2 + $0x50] sm:$0xff] }
  0x71   : > { %937 = vmatprep.subr.bf16.mxu1 %v936_v15  ;;  %v920_v26 = vpack.c.bf16 %v320_v22, %v319_v21  ;;  %v322_v28 = vld [vmem:[%s1576_s2 + $0x58] sm:$0xff]  ;;  %v948_v29 = vpack.c.bf16 %v413_v25, %v412_v24  ;;  %v414_v30 = vld [vmem:[%s1577_s3 + $0x40] sm:$0xff]  ;;  %v415_v31 = vld [vmem:[%s1577_s3 + $0x48] sm:$0xff] }
  0x72   : > { %911 = vmatpush3.bf16.msra.mxu0 %v908_v5  ;;  %939 = vmatpush3.bf16.msra.mxu1 %v936_v15  ;;  %v924_v32 = vpack.c.bf16 %v322_v28, %v321_v27  ;;  %v323_v33 = vld [vmem:[%s1576_s2 + $0x60] sm:$0xff]  ;;  %v324_v34 = vld [vmem:[%s1576_s2 + $0x68] sm:$0xff]  ;;  %v952_v35 = vpack.c.bf16 %v415_v31, %v414_v30  ;;  %v416_v36 = vld [vmem:[%s1577_s3 + $0x50] sm:$0xff] }
  0x73   : > { %913 = vmatprep.subr.bf16.mxu0 %v912_v8  ;;  %941 = vmatprep.subr.bf16.mxu1 %v940_v17  ;;  %v417_v37 = vld [vmem:[%s1577_s3 + $0x58] sm:$0xff]  ;;  %v928_v38 = vpack.c.bf16 %v324_v34, %v323_v33  ;;  %v325_v39 = vld [vmem:[%s1576_s2 + $0x70] sm:$0xff]  ;;  %v418_v42 = vld [vmem:[%s1577_s3 + $0x60] sm:$0xff] }
  0x74   : > { %v326_v40 = vld [vmem:[%s1576_s2 + $0x78] sm:$0xff]  ;;  %v956_v41 = vpack.c.bf16 %v417_v37, %v416_v36  ;;  %v419_v43 = vld [vmem:[%s1577_s3 + $0x68] sm:$0xff]  ;;  %v420_v47 = vld [vmem:[%s1577_s3 + $0x70] sm:$0xff] }
  0x75   : > { %v932_v44 = vpack.c.bf16 %v326_v40, %v325_v39  ;;  %v960_v45 = vpack.c.bf16 %v419_v43, %v418_v42  ;;  %v308_v46 = vld [vmem:[%s252_s11 + $0x8] sm:$0xff]  ;;  %v309_v51 = vld [vmem:[%s261_s7] sm:$0xff]  ;;  %s422_s11 = sld [smem:[#allocation2]] }
  0x76   : > { %915 = vmatpush3.bf16.msra.mxu0 %v912_v8  ;;  %943 = vmatpush3.bf16.msra.mxu1 %v940_v17  ;;  %v421_v48 = vld [vmem:[%s1577_s3 + $0x78] sm:$0xff] }
  0x77   : > { %917 = vmatprep.subr.bf16.mxu0 %v916_v20  ;;  %945 = vmatprep.subr.bf16.mxu1 %v944_v23  ;;  %v964_v49 = vpack.c.bf16 %v421_v48, %v420_v47  ;;  %v310_v50 = vld [vmem:[%s261_s7 + $0x8] sm:$0xff]  ;;  %s777_s7 = sshll.u32 (%p1583_p7), %s1288_s4, 1 }
  0x78   : > { %s510_s9 = ssub.s32 (%p1583_p7), 7, %s777_s7 }
  0x79   : > { %p511_p4 = scmp.lt.s32.totalorder (%p1583_p7), %s510_s9, 2 }
  0x7a   : > { %919 = vmatpush3.bf16.msra.mxu0 %v916_v20  ;;  %947 = vmatpush3.bf16.msra.mxu1 %v944_v23 }
  0x7b   : > { %921 = vmatprep.subr.bf16.mxu0 %v920_v26  ;;  %949 = vmatprep.subr.bf16.mxu1 %v948_v29  ;;  %v423_v58 = vstv %s422_s11 }
  0x7e   : > { %923 = vmatpush3.bf16.msra.mxu0 %v920_v26  ;;  %951 = vmatpush3.bf16.msra.mxu1 %v948_v29 }
  0x7f   : > { %925 = vmatprep.subr.bf16.mxu0 %v924_v32  ;;  %953 = vmatprep.subr.bf16.mxu1 %v952_v35 }
  0x82   : > { %927 = vmatpush3.bf16.msra.mxu0 %v924_v32  ;;  %955 = vmatpush3.bf16.msra.mxu1 %v952_v35 }
  0x83   : > { %929 = vmatprep.subr.bf16.mxu0 %v928_v38  ;;  %957 = vmatprep.subr.bf16.mxu1 %v956_v41 }
  0x86   : > { %931 = vmatpush3.bf16.msra.mxu0 %v928_v38  ;;  %959 = vmatpush3.bf16.msra.mxu1 %v956_v41 }
  0x87   : > { %933 = vmatprep.subr.bf16.mxu0 %v932_v44  ;;  %961 = vmatprep.subr.bf16.mxu1 %v960_v45 }
  0x8a   : > { %935 = vmatpush3.bf16.msra.mxu0 %v932_v44  ;;  %963 = vmatpush3.bf16.msra.mxu1 %v960_v45 }
  0x8b   : > { %965 = vmatprep.subr.bf16.mxu1 %v964_v49 }
  0x8d   : > { %867 = vmatmul.mubr.f32.vlgmr.msra.gmra.mrb[0].mxu0 %v308_v46 }
  0x8e   : > { %967 = vmatpush3.bf16.msra.mxu1 %v964_v49 }
 0x160   : > { %v868_v52 = vpop.f32.mrb[0].mxu0 }
 0x161   : > { %v403_v53 = vsub.f32 %v310_v50, %v868_v52  ;;  %v393_v54 = vpop.f32.mrb[1].mxu0 }
 0x162   : > { %v402_v55 = vsub.f32 %v309_v51, %v393_v54 }
 0x163   : > { %v405_v57 = vmul.f32 %v403_v53, %v403_v53 }
 0x164   : > { %v404_v56 = vmul.f32 %v402_v55, %v402_v55 }
 0x166   : > { %901 = vmatprep.mubr.f32.mxu1 %v404_v56 }
 0x167   : > { %902 = vmatmul.mubr.f32.vlgmr.msra.gmra.mrb[0].mxu1 %v405_v57 }
 0x238   : > { %508 = sbr.rel (!%p1583_p7) target bundleno = 624 (0x270), region = 52 }
 0x23a   : > { %v903_v59 = vpop.f32.mrb[0].mxu1 }
 0x23b   : > { %v496_v60 = vadd.f32 %v903_v59, %v423_v58  ;;  %v490_v61 = vpop.f32.mrb[1].mxu1 }
 0x23c   : > { %v491_v62 = vadd.f32 %v490_v61, %v423_v58 }
 0x23d   : > { %501 = vst.msk [vmem:[%s1526_s28 + $0x8] sm:$0xff] %vm499_vm0, %v496_v60 }
 0x23e   : > { %500 = vst.msk [vmem:[%s1526_s28] sm:$0xff] %vm499_vm0, %v491_v62 }
 0x23f   : > { %s1593_s9 = smov (!%p511_p4, %s510_s9), 2 }
 0x240   : > { %s778_s17 = sshll.u32 %s1593_s9, 7 }
 0x241   : > { %p781_p13 = scmp.eq.s32.totalorder %s778_s17, 0 }
 0x242   : > { %s1543_s30 = sshrl.u32 (!%p781_p13), %s1593_s9, 1 }
 0x243   : > { %519 = sbr.rel (%p781_p13) target bundleno = 624 (0x270), region = 56  ;;  %p782_p1 = scmp.le.s32.totalorder (!%p781_p13), %s1543_s30, 0 }
 0x24a   : > { %699 = sbr.rel (%p782_p1) target bundleno = 603 (0x25b), region = 147  ;;  %s1198_s4 = smov (!%p782_p1), %s1537_s18  }
 0x24b   : > { %s1202_s8 = smov (!%p782_p1), %s1526_s28   ;;  %s1206_s13 = smov (!%p782_p1), 0  }
 0x24c   : > { %s1210_s14 = smov (!%p782_p1), 0  }
 0x251 LB: >> { %v583_v63 = vld [vmem:[%s1204_s8] sm:$0xff]  ;;  %v585_v0 = vld [vmem:[%s1204_s8 + $0x8] sm:$0xff]  ;;  %s587_s15 = sadd.s32 1, %s1208_s13  ;;  %s577_s14 = sadd.s32 1, %s1212_s14   ;;  %s1212_s14 = sphi %s1210_s14, %s577_s14   ;;  %s1208_s13 = sphi %s1206_s13, %s1207_s13   ;;  %s1204_s8 = sphi %s1202_s8, %s592_s8   ;;  %s1200_s4 = sphi %s1198_s4, %s593_s4  }
 0x252   : >> { %584 = vst [vmem:[%s1200_s4] sm:$0xff] %v583_v63  ;;  %586 = vst [vmem:[%s1200_s4 + $0x8] sm:$0xff] %v585_v0  ;;  %p588_p2 = scmp.ge.s32.totalorder %s587_s15, %s1543_s30  ;;  %p576_p3 = scmp.ge.s32.totalorder %s577_s14, %s1543_s30 }
 0x254   : >> { %s1595_s15 = smov (%p588_p2, %s587_s15), 0  ;;  %579 = sbr.rel (!%p576_p3) target bundleno = 593 (0x251), region = 153 }
 0x255   : >> { %s783_s16 = sshll.u32 %s1595_s15, 4  ;;  %s1207_s13 = smov %s1595_s15  }
 0x256   : >> { %s592_s8 = scalar_lea.vmem %s1526_s28, %s783_s16 [#allocation7]   ;;  %s593_s4 = scalar_lea.vmem %s1537_s18, %s783_s16  }
 0x25b PF: > { %s1553_s19 = sand.u32 1, %s1593_s9   ;;  %s796_s29 = sshll.u32 %s1543_s30, 4 }
 0x25c   : > { %s598_s20 = scalar_lea.vmem %s1526_s28, %s796_s29 [#allocation7]   ;;  %s600_s25 = scalar_lea.vmem %s1537_s18, %s796_s29  }
 0x25d   : > { %p788_p8 = scmp.le.s32.totalorder %s1553_s19, 0 }
 0x25e   : > { %s1214_s6 = smov (!%p788_p8), %s600_s25   ;;  %s1218_s10 = smov (!%p788_p8), %s598_s20  }
 0x25f   : > { %713 = sbr.rel (%p788_p8) target bundleno = 624 (0x270), region = 158  ;;  %s1222_s11 = smov (!%p788_p8), 0  }
 0x260   : > { %s1226_s7 = smov (!%p788_p8), 0  }
 0x266 LB: >> { %v610_v1 = vld [vmem:[%s1220_s10] sm:$0xff]  ;;  %s612_s12 = sadd.s32 1, %s1224_s11  ;;  %s604_s7 = sadd.s32 1, %s1228_s7   ;;  %s1228_s7 = sphi %s1226_s7, %s604_s7   ;;  %s1224_s11 = sphi %s1222_s11, %s1223_s11   ;;  %s1220_s10 = sphi %s1218_s10, %s617_s10   ;;  %s1216_s6 = sphi %s1214_s6, %s618_s6  }
 0x267   : >> { %611 = vst [vmem:[%s1216_s6] sm:$0xff] %v610_v1  ;;  %p613_p11 = scmp.ge.s32.totalorder %s612_s12, %s1553_s19  ;;  %p603_p0 = scmp.ge.s32.totalorder %s604_s7, %s1553_s19 }
 0x269   : >> { %s1597_s12 = smov (%p613_p11, %s612_s12), 0  ;;  %606 = sbr.rel (!%p603_p0) target bundleno = 614 (0x266), region = 164 }
 0x26a   : >> { %s789_s28 = sshll.u32 %s1597_s12, 3  ;;  %s1223_s11 = smov %s1597_s12  }
 0x26b   : >> { %s617_s10 = scalar_lea.vmem %s598_s20, %s789_s28 [#allocation7]   ;;  %s618_s6 = scalar_lea.vmem %s600_s25, %s789_s28  }
 0x270 PF: > { %p19_p6 = scmp.ge.s32.totalorder %s1291_s24, 6   ;;  %s1584_s20 = smov %s1188_s21 }
 0x271   : > { %s1585_s21 = smov %s1192_s22  ;;  %s1586_s22 = smov %s1301_s27 }
 0x272   : > { %s1587_s23 = smov %s1291_s24  ;;  %21 = sbr.rel (!%p19_p6) target bundleno = 7 (0x7), region = 175 }
 0x279   :  { %634 = vsyncpa [#allocation4], 1 }
 0x27a   :  { %636 = vsyncpa [#allocation4 + $0x1], 1 }
 0x27b   :  { %637 = vsyncpa [#allocation6], 1 }
 0x27c   :  { %639 = vsyncpa [#allocation6 + $0x1], 1 }

</bundles_post_ra>
